<compile_context>
chip_gen: v7x
topology: tpu7x:2x2x1
jax: 0.10.0
libtpu: 0.0.40
codegen_flags: <defaults>
</compile_context>

<pallas_src>
import functools

import jax
import jax.numpy as jnp
from jax.experimental import pallas as pl
from jax.experimental.pallas import tpu as pltpu


def _round_up(v, m):
    return ((v + m - 1) // m) * m


def _pick_tile(dim, max_tile, align):
    """Return (tile, padded_dim) for one array axis.

    If dim <= align the whole (unpadded) dim is a single block (allowed because
    the block then equals the full array dim).  Otherwise pad to `align`
    granularity and grow the tile by 2x only while the extra padding stays
    small (<= max(align, dim // 8), i.e. <= ~12.5% wasted work).
    """
    if dim <= align:
        return dim, dim
    tile = align
    padded = _round_up(dim, align)
    waste_cap = max(align, dim // 8)
    t = align * 2
    while t <= max_tile:
        p = _round_up(dim, t)
        if p - dim <= waste_cap:
            tile, padded = t, p
        t *= 2
    return tile, padded


def _linear_kernel_direct(x_ref, w_ref, b_ref, o_ref):
    """f32 output path: accumulate straight into the VMEM-resident out block."""
    k = pl.program_id(2)

    @pl.when(k == 0)
    def _():
        o_ref[...] = jnp.zeros_like(o_ref)

    o_ref[...] += jnp.dot(x_ref[...], w_ref[...],
                          preferred_element_type=jnp.float32)

    @pl.when(k == pl.num_programs(2) - 1)
    def _():
        o_ref[...] += b_ref[...].astype(o_ref.dtype)


def _linear_kernel_acc(x_ref, w_ref, b_ref, o_ref, acc_ref):
    """Narrow-output path: f32 VMEM accumulator, single downcast at the end."""
    k = pl.program_id(2)

    @pl.when(k == 0)
    def _():
        acc_ref[...] = jnp.zeros_like(acc_ref)

    acc_ref[...] += jnp.dot(x_ref[...], w_ref[...],
                            preferred_element_type=jnp.float32)

    @pl.when(k == pl.num_programs(2) - 1)
    def _():
        o_ref[...] = (acc_ref[...]
                      + b_ref[...].astype(jnp.float32)).astype(o_ref.dtype)


@functools.partial(
    jax.jit, static_argnames=("block_m", "block_n", "block_k", "compute_dtype"))
def linear_pallas(x, weight, bias, *, block_m=512, block_n=1024, block_k=512,
                  compute_dtype=None):
    """out = x @ weight.T + bias  (PyTorch nn.Linear semantics).

    x: (M, K), weight: (N, K) [PyTorch layout], bias: (N,).
    """
    M, K = x.shape
    N, K2 = weight.shape
    assert K == K2, "in_size mismatch"

    out_dtype = x.dtype

    # One-time wrapper transpose of W to (K, N): the in-kernel contraction is a
    # plain (tm,tk)x(tk,tn) MXU matmul with no per-tile transpose.
    wT = weight.T
    if compute_dtype is not None:
        x = x.astype(compute_dtype)
        wT = wT.astype(compute_dtype)

    # --- tile sizes / padded extents (trace-time Python ints) --------------
    tm, Mp = _pick_tile(M, block_m, 8)      # sublane-aligned batch tile
    tn, Np = _pick_tile(N, block_n, 128)    # lane-dense output tile
    tk, Kp = _pick_tile(K, block_k, 128)    # reduction tile (K just streams)

    # v7x has 2 TensorCores: make sure the two "parallel" grid axes expose at
    # least 2 blocks when shapes allow (costs ~nothing on single-TC v5e/v6e).
    if (Mp // tm) * (Np // tn) < 2:
        if tn % 256 == 0:
            tn //= 2
        elif tm % 16 == 0:
            tm //= 2

    # --- VMEM budget --------------------------------------------------------
    in_bytes = jnp.dtype(x.dtype).itemsize
    out_bytes = jnp.dtype(out_dtype).itemsize
    use_acc = jnp.dtype(out_dtype) != jnp.dtype(jnp.float32)

    try:
        vmem_cap = pltpu.get_tpu_info().vmem_capacity_bytes
    except Exception:
        vmem_cap = 64 * 1024 * 1024  # conservative (v7x per-TC)
    vmem_limit = min(int(vmem_cap * 0.75), 100 * 1024 * 1024)

    def _tiles_bytes(tm_, tn_, tk_):
        b = 2 * (tm_ * tk_ + tk_ * tn_) * in_bytes      # double-buffered x, W
        b += 2 * tm_ * tn_ * out_bytes + 2 * tn_ * 4    # out + bias buffers
        if use_acc:
            b += tm_ * tn_ * 4
        return b

    # Shrink tiles (tk first, then tn, then tm) until they fit comfortably.
    while _tiles_bytes(tm, tn, tk) > int(vmem_limit * 0.8):
        if tk % 256 == 0:
            tk //= 2
        elif tn % 256 == 0:
            tn //= 2
        elif tm % 16 == 0:
            tm //= 2
        else:
            break

    # --- zero-pad only when ragged ------------------------------------------
    xp = x if (Mp == M and Kp == K) else jnp.pad(x, ((0, Mp - M), (0, Kp - K)))
    wp = wT if (Kp == K and Np == N) else jnp.pad(
        wT, ((0, Kp - K), (0, Np - N)))
    bp = bias if Np == N else jnp.pad(bias, (0, Np - N))
    b2 = bp.reshape(1, Np)

    grid = (Mp // tm, Np // tn, Kp // tk)

    cost = pl.CostEstimate(
        flops=2 * Mp * Np * Kp,
        transcendentals=0,
        bytes_accessed=((Np // tn) * Mp * Kp * in_bytes      # x re-reads
                        + (Mp // tm) * Kp * Np * in_bytes    # W re-reads
                        + Np * 4 + Mp * Np * out_bytes),
    )

    kernel = _linear_kernel_acc if use_acc else _linear_kernel_direct
    scratch = [pltpu.VMEM((tm, tn), jnp.float32)] if use_acc else []

    out_p = pl.pallas_call(
        kernel,
        out_shape=jax.ShapeDtypeStruct((Mp, Np), out_dtype),
        grid_spec=pltpu.PrefetchScalarGridSpec(
            num_scalar_prefetch=0,
            grid=grid,
            in_specs=[
                pl.BlockSpec((tm, tk), lambda i, j, k: (i, k)),   # x tile
                pl.BlockSpec((tk, tn), lambda i, j, k: (k, j)),   # W.T tile
                pl.BlockSpec((1, tn), lambda i, j, k: (0, j)),    # bias tile
            ],
            out_specs=pl.BlockSpec((tm, tn), lambda i, j, k: (i, j)),
            scratch_shapes=scratch,
        ),
        compiler_params=pltpu.CompilerParams(
            dimension_semantics=("parallel", "parallel", "arbitrary"),
            vmem_limit_bytes=vmem_limit,
        ),
        cost_estimate=cost,
    )(xp, wp, b2)

    if Mp != M or Np != N:
        out_p = out_p[:M, :N]
    return out_p


def init_linear_params(key, in_size, out_size, dtype=jnp.float32):
    # Deterministic init mirroring nn.Linear's default U(-1/sqrt(in), 1/sqrt(in)).
    kw, kb = jax.random.split(key)
    bound = 1.0 / (in_size ** 0.5)
    weight = jax.random.uniform(kw, (out_size, in_size), dtype, -bound, bound)
    bias = jax.random.uniform(kb, (out_size,), dtype, -bound, bound)
    return weight, bias


if __name__ == "__main__":
    key = jax.random.PRNGKey(0)
    k_x, k_p, k_x2, k_p2 = jax.random.split(key, 4)

    # Small shapes consistent with the module (batch=8, in=32, out=16).
    batch, in_size, out_size = 8, 32, 16
    x = jax.random.normal(k_x, (batch, in_size), dtype=jnp.float32)
    weight, bias = init_linear_params(k_p, in_size, out_size)

    out = linear_pallas(x, weight, bias)
    jax.block_until_ready(out)
    ref = x @ weight.T + bias
    assert out.shape == (batch, out_size)
    assert jnp.allclose(out, ref, atol=1e-5, rtol=1e-5), "mismatch vs reference"

    # Second (ragged) shape to exercise the padded / multi-block grid path.
    batch2, in2, out2 = 64, 160, 136
    x2 = jax.random.normal(k_x2, (batch2, in2), dtype=jnp.float32)
    weight2, bias2 = init_linear_params(k_p2, in2, out2)

    out_b = linear_pallas(x2, weight2, bias2)
    jax.block_until_ready(out_b)
    ref_b = x2 @ weight2.T + bias2
    assert out_b.shape == (batch2, out2)
    assert jnp.allclose(out_b, ref_b, atol=2e-2, rtol=2e-2), "mismatch vs reference (ragged)"

    print("KERNEL_OK")
</pallas_src>

<mosaic_0001>
module attributes {stable_mosaic.version = 11 : i64} {
  func.func @_linear_kernel_direct(%arg0: i32, %arg1: i32, %arg2: i32, %arg3: memref<8x32xf32, #tpu.memory_space<vmem>>, %arg4: memref<32x16xf32, #tpu.memory_space<vmem>>, %arg5: memref<1x16xf32, #tpu.memory_space<vmem>>, %arg6: memref<8x16xf32, #tpu.memory_space<vmem>>) attributes {dimension_semantics = [#tpu.dimension_semantics<parallel>, #tpu.dimension_semantics<parallel>, #tpu.dimension_semantics<arbitrary>], iteration_bounds = array<i64: 1, 1, 1>, scalar_prefetch = 0 : i64, scratch_operands = 0 : i64, tpu.core_type = #tpu.core_type<tc>, window_params = [{transform_indices = @transform_0, window_bounds = array<i64: 8, 32>}, {transform_indices = @transform_1, window_bounds = array<i64: 32, 16>}, {transform_indices = @transform_2, window_bounds = array<i64: 1, 16>}, {transform_indices = @transform_3, window_bounds = array<i64: 8, 16>}]} {
    %c0_i32 = arith.constant 0 : i32
    %0 = arith.cmpi eq, %arg2, %c0_i32 : i32
    %1 = arith.extui %0 : i1 to i32
    %c0_i32_0 = arith.constant 0 : i32
    %2 = arith.cmpi ne, %1, %c0_i32_0 : i32
    scf.if %2 {
      %cst_10 = arith.constant 0.000000e+00 : f32
      %12 = vector.broadcast %cst_10 : f32 to vector<8x16xf32>
      %c0_11 = arith.constant 0 : index
      %c0_12 = arith.constant 0 : index
      %13 = vector.load %arg6[%c0_11, %c0_12] : memref<8x16xf32, #tpu.memory_space<vmem>>, vector<8x16xf32>
      tpu.vector_store %arg6[%c0_11, %c0_12], %12 {strides = array<i32>} : memref<8x16xf32, #tpu.memory_space<vmem>>, vector<8x16xf32>,
    } else {
    }
    %c0 = arith.constant 0 : index
    %c0_1 = arith.constant 0 : index
    %3 = vector.load %arg6[%c0, %c0_1] : memref<8x16xf32, #tpu.memory_space<vmem>>, vector<8x16xf32>
    %c0_2 = arith.constant 0 : index
    %c0_3 = arith.constant 0 : index
    %4 = vector.load %arg3[%c0_2, %c0_3] : memref<8x32xf32, #tpu.memory_space<vmem>>, vector<8x32xf32>
    %c0_4 = arith.constant 0 : index
    %c0_5 = arith.constant 0 : index
    %5 = vector.load %arg4[%c0_4, %c0_5] : memref<32x16xf32, #tpu.memory_space<vmem>>, vector<32x16xf32>
    %cst = arith.constant dense<0.000000e+00> : vector<8x16xf32>
    %6 = tpu.matmul %4, %5, %cst {dimension_numbers = #tpu.dot_dimension_numbers<[1], [0], [0], [1], [0, 0, 1, 1], [], []>} : vector<8x32xf32>, vector<32x16xf32>, vector<8x16xf32> -> vector<8x16xf32>
    %7 = arith.addf %3, %6 : vector<8x16xf32>
    %c0_6 = arith.constant 0 : index
    %c0_7 = arith.constant 0 : index
    %8 = vector.load %arg6[%c0_6, %c0_7] : memref<8x16xf32, #tpu.memory_space<vmem>>, vector<8x16xf32>
    tpu.vector_store %arg6[%c0_6, %c0_7], %7 {strides = array<i32>} : memref<8x16xf32, #tpu.memory_space<vmem>>, vector<8x16xf32>,
    %c0_i32_8 = arith.constant 0 : i32
    %9 = arith.cmpi eq, %arg2, %c0_i32_8 : i32
    %10 = arith.extui %9 : i1 to i32
    %c0_i32_9 = arith.constant 0 : i32
    %11 = arith.cmpi ne, %10, %c0_i32_9 : i32
    scf.if %11 {
      %c0_10 = arith.constant 0 : index
      %c0_11 = arith.constant 0 : index
      %12 = vector.load %arg6[%c0_10, %c0_11] : memref<8x16xf32, #tpu.memory_space<vmem>>, vector<8x16xf32>
      %c0_12 = arith.constant 0 : index
      %c0_13 = arith.constant 0 : index
      %13 = vector.load %arg5[%c0_12, %c0_13] : memref<1x16xf32, #tpu.memory_space<vmem>>, vector<1x16xf32>
      %14 = vector.broadcast %13 : vector<1x16xf32> to vector<8x16xf32>
      %15 = arith.addf %12, %14 : vector<8x16xf32>
      %c0_14 = arith.constant 0 : index
      %c0_15 = arith.constant 0 : index
      %16 = vector.load %arg6[%c0_14, %c0_15] : memref<8x16xf32, #tpu.memory_space<vmem>>, vector<8x16xf32>
      tpu.vector_store %arg6[%c0_14, %c0_15], %15 {strides = array<i32>} : memref<8x16xf32, #tpu.memory_space<vmem>>, vector<8x16xf32>,
    } else {
    }
    return
  }
  func.func @transform_0(%arg0: i32, %arg1: i32, %arg2: i32) -> (i32, i32) {
    %c0_i32 = arith.constant 0 : i32
    return %arg0, %arg2 : i32, i32
  }
  func.func @transform_1(%arg0: i32, %arg1: i32, %arg2: i32) -> (i32, i32) {
    %c0_i32 = arith.constant 0 : i32
    return %arg2, %arg1 : i32, i32
  }
  func.func @transform_2(%arg0: i32, %arg1: i32, %arg2: i32) -> (i32, i32) {
    %c0_i32 = arith.constant 0 : i32
    %c0_i32_0 = arith.constant 0 : i32
    return %c0_i32, %arg1 : i32, i32
  }
  func.func @transform_3(%arg0: i32, %arg1: i32, %arg2: i32) -> (i32, i32) {
    %c0_i32 = arith.constant 0 : i32
    return %arg0, %arg1 : i32, i32
  }
}

</mosaic_0001>

<bundles_post_ra>
// kernel: linear_pallas.1
= control target key start
LH: loop header
LB: loop body
LE: loop exit
PB: predicated region body
PF: predicated region fallthrough
CT: control target
= control target key end

     0   :  { %vm19_vm0 = vcmask 130048   ;;  %v183_v3 = vmov 0.0|0.0   ;;  %v184_v6 = vmov 0.0   ;;  %s240_s0 = inlined_call_operand.vmem [shape: f32[8,32], index: 0, kind: input, shape index: {}]   ;;  %s241_s1 = inlined_call_operand.vmem [shape: f32[32,16], index: 1, kind: input, shape index: {}]   ;;  %s242_s2 = inlined_call_operand.vmem [shape: f32[1,16], index: 2, kind: input, shape index: {}]   ;;  %s243_s3 = inlined_call_operand.hbm [shape: f32[8,16], index: 3, kind: output, shape index: {}]  }
   0x1   :  { %v23_v0 = vld [vmem:[%s241_s1] sm:$0xff]  ;;  %v24_v1 = vld [vmem:[%s241_s1 + $0x8] sm:$0xff]  ;;  %v25_v2 = vld [vmem:[%s241_s1 + $0x10] sm:$0xff]  ;;  %149 = vmatprep.subr.bf16.mxu0 %v183_v3  ;;  %20 = vst.msk [vmem:[#allocation2] sm:$0xff] %vm19_vm0, %v184_v6 }
   0x2   :  { %v150_v4 = vpack.c.bf16 %v24_v1, %v23_v0  ;;  %v26_v5 = vld [vmem:[%s241_s1 + $0x18] sm:$0xff] }
   0x3   :  { %8 = vsyncpa [#allocation3], 0  ;;  %vm185_vm1 = vmmov 0   ;;  %v153_v7 = vpack.c.bf16 %v26_v5, %v25_v2  ;;  %v22_v8 = vld [vmem:[%s240_s0] sm:$0xff]  ;;  %vm27_vm2 = vcmask 261120   ;;  %s186_s23 = smov [#allocation2]  }
   0x4   :  { %146 = vmatprep.mubr.msk.f32.mxu0 %vm185_vm1, %v184_v6  ;;  %151 = vmatpush3.bf16.msra.mxu0 %v150_v4  ;;  %v132_v13 = vld [vmem:[%s242_s2] ss:$0 sm:$0xff]  ;;  %s123_s24 = sshll.u32 %s186_s23, 4  ;;  %s124_s24 = int_to_ptr.vmem [resolvable:$true] %s123_s24 }
   0x5   :  { %152 = vmatprep.subr.bf16.mxu0 %v183_v3  ;;  %s159_s0 = scalar_lea.vmem %s124_s24, 128  ;;  %p164_p1 = scmp.lt.s32.totalorder %s124_s24, %s124_s24 }
   0x6   :  { %p160_p0 = scmp.ne.s32.totalorder %s124_s24, %s159_s0  ;;  %p165_p2 = scmp.lt.s32.totalorder %s159_s0, %s159_s0 }
   0x8   :  { %154 = vmatpush3.bf16.msra.mxu0 %v153_v7  ;;  %v21_v9 = vld [vmem:[#allocation2] sm:$0xff]  ;;  %p166_p3 = por %p165_p2, %p164_p1 }
   0xa   :  { %p167_p4 = pnand %p166_p3, %p160_p0 }
   0xb   :  { %147 = vmatmul.mubr.msk.f32.vlgmr.msra.gmra.mrb[0].mxu0 %vm27_vm2, %v22_v8 }
  0xde   :  { %v97_v10 = vpop.f32.mrb[0].mxu0 }
  0xdf   :  { %v101_v11 = vadd.f32 %v97_v10, %v21_v9  ;;  %v148_v12 = vpop.f32.mrb[1].mxu0 }
  0xe1   :  { %103 = vst.msk [vmem:[#allocation2] sm:$0xff] %vm19_vm0, %v101_v11 }
  0xe8   :  { %v107_v14 = vld [vmem:[#allocation2] sm:$0xff] }
  0xe9   :  { %v115_v15 = vadd.f32 %v132_v13, %v107_v14 }
  0xeb   :  { %116 = vst.msk [vmem:[#allocation2] sm:$0xff] %vm19_vm0, %v115_v15 }
  0xec   :  { %170 = shalt.err (!%p167_p4)
}
  0xed   :  { %s171_s27 = scalar_lea.hbm %s243_s3, 128 }
  0xee   :  { %p172_p5 = scmp.ne.s32.totalorder %s243_s3, %s171_s27  ;;  %p175_p6 = scmp.lt.u32.totalorder %s171_s27, %s243_s3 }
  0xf0   :  { %p177_p7 = pnand %p175_p6, %p172_p5 }
  0xf2   :  { %180 = shalt.err (!%p177_p7)
}
  0xf3   :  { %126 = dma.vmem_to_hbm [thread:$0]  %s124_s24, 128, %s243_s3, [#allocation3]  }
  0xf4   :  { %181 = dma.done.wait [#allocation3], 128  }
  0xf5   :  { %182 = vsyncadd [#allocation3], 4294967168 }
  0xf6   :  { %130 = vsyncpa [#allocation3], 1 }

</bundles_post_ra>
